<compile_context>
chip_gen: v6e
topology: v6e:2x2x1
jax: 0.10.0
libtpu: 0.0.40
codegen_flags: <defaults>
</compile_context>

<pallas_src>
import jax
import jax.numpy as jnp
from jax.experimental import pallas as pl
from jax.experimental.pallas import tpu as pltpu

IN_FEATURES = 5
HIDDEN = 10
OUT_FEATURES = 20
LANE = 128  # TPU lane width; pad out-features to this for lane-dense stores


def _round_up(n, m):
    return ((n + m - 1) // m) * m


def _fused_linear_kernel(x_ref, w_ref, b_ref, o_ref):
    # (TB, 5) @ (5, 128) + (1, 128) -> (TB, 128), single dot + broadcast add.
    o_ref[...] = (
        jnp.dot(x_ref[...], w_ref[...], preferred_element_type=jnp.float32)
        + b_ref[...]
    ).astype(o_ref.dtype)


def submodule1_forward(x, w1, b1, w2, b2, *, tb=1024):
    """Pallas equivalent of SubModule1.forward: returns (fc2(fc1(x)), None).

    x : (B, 5)   float32
    w1: (5, 10)  fc1.weight.T
    b1: (10,)    fc1.bias
    w2: (10, 20) fc2.weight.T
    b2: (20,)    fc2.bias
    """
    B = x.shape[0]
    dtype = x.dtype

    # --- exact algebraic fusion of the two linears (plain JAX, outside kernel)
    w_eff = w1 @ w2                       # (5, 20)
    b_eff = (b1 @ w2 + b2).reshape(1, -1)  # (1, 20)

    # --- pad out-features to a full 128-lane width (lane-dense output)
    w_pad = jnp.zeros((IN_FEATURES, LANE), dtype).at[:, :OUT_FEATURES].set(
        w_eff.astype(dtype))
    b_pad = jnp.zeros((1, LANE), dtype).at[:, :OUT_FEATURES].set(
        b_eff.astype(dtype))

    # --- batch tiling: TB multiple of 8 sublanes, capped at `tb`
    tb_eff = min(_round_up(tb, 8), _round_up(B, 8))
    b_padded = _round_up(B, tb_eff)
    if b_padded != B:
        x = jnp.pad(x, ((0, b_padded - B), (0, 0)))

    grid = (b_padded // tb_eff,)

    out = pl.pallas_call(
        _fused_linear_kernel,
        out_shape=jax.ShapeDtypeStruct((b_padded, LANE), dtype),
        grid=grid,
        in_specs=[
            pl.BlockSpec((tb_eff, IN_FEATURES), lambda i: (i, 0)),  # x tile
            pl.BlockSpec((IN_FEATURES, LANE), lambda i: (0, 0)),    # W_eff (resident)
            pl.BlockSpec((1, LANE), lambda i: (0, 0)),              # b_eff (resident)
        ],
        out_specs=pl.BlockSpec((tb_eff, LANE), lambda i: (i, 0)),
        compiler_params=pltpu.CompilerParams(
            dimension_semantics=("parallel",)),
    )(x, w_pad, b_pad)

    return out[:B, :OUT_FEATURES], None


def init_params(key):
    """Deterministic init matching nn.Linear shapes (Kaiming-uniform-ish)."""
    k1, k2, k3, k4 = jax.random.split(key, 4)
    bound1 = 1.0 / jnp.sqrt(5.0)
    w1 = jax.random.uniform(k1, (IN_FEATURES, HIDDEN), jnp.float32, -bound1, bound1)
    b1 = jax.random.uniform(k2, (HIDDEN,), jnp.float32, -bound1, bound1)
    bound2 = 1.0 / jnp.sqrt(10.0)
    w2 = jax.random.uniform(k3, (HIDDEN, OUT_FEATURES), jnp.float32, -bound2, bound2)
    b2 = jax.random.uniform(k4, (OUT_FEATURES,), jnp.float32, -bound2, bound2)
    return w1, b1, w2, b2


if __name__ == "__main__":
    key = jax.random.PRNGKey(0)
    kx, kp = jax.random.split(key)

    B = 8  # small batch
    x = jax.random.normal(kx, (B, IN_FEATURES), jnp.float32)
    w1, b1, w2, b2 = init_params(kp)

    out, none_out = submodule1_forward(x, w1, b1, w2, b2)
    out = jax.block_until_ready(out)

    # reference check in plain JAX (original two-linear formulation)
    ref = (x @ w1 + b1) @ w2 + b2
    assert out.shape == (B, OUT_FEATURES)
    assert none_out is None
    assert jnp.allclose(out, ref, atol=1e-5, rtol=1e-5)

    print("KERNEL_OK")
</pallas_src>

<mosaic_0001>
module attributes {stable_mosaic.version = 11 : i64} {
  func.func @_fused_linear_kernel(%arg0: i32, %arg1: memref<8x5xf32, #tpu.memory_space<vmem>>, %arg2: memref<5x128xf32, #tpu.memory_space<vmem>>, %arg3: memref<1x128xf32, #tpu.memory_space<vmem>>, %arg4: memref<8x128xf32, #tpu.memory_space<vmem>>) attributes {dimension_semantics = [#tpu.dimension_semantics<parallel>], iteration_bounds = array<i64: 1>, scalar_prefetch = 0 : i64, scratch_operands = 0 : i64, tpu.core_type = #tpu.core_type<tc>, window_params = [{transform_indices = @transform_0, window_bounds = array<i64: 8, 5>}, {pipeline_mode = #tpu.pipeline_mode<synchronous>, transform_indices = @transform_1, window_bounds = array<i64: 5, 128>}, {pipeline_mode = #tpu.pipeline_mode<synchronous>, transform_indices = @transform_2, window_bounds = array<i64: 1, 128>}, {transform_indices = @transform_3, window_bounds = array<i64: 8, 128>}]} {
    %c0 = arith.constant 0 : index
    %c0_0 = arith.constant 0 : index
    %0 = vector.load %arg1[%c0, %c0_0] : memref<8x5xf32, #tpu.memory_space<vmem>>, vector<8x5xf32>
    %c0_1 = arith.constant 0 : index
    %c0_2 = arith.constant 0 : index
    %1 = vector.load %arg2[%c0_1, %c0_2] : memref<5x128xf32, #tpu.memory_space<vmem>>, vector<5x128xf32>
    %cst = arith.constant dense<0.000000e+00> : vector<8x128xf32>
    %2 = tpu.matmul %0, %1, %cst {dimension_numbers = #tpu.dot_dimension_numbers<[1], [0], [0], [1], [0, 0, 1, 1], [], []>} : vector<8x5xf32>, vector<5x128xf32>, vector<8x128xf32> -> vector<8x128xf32>
    %c0_3 = arith.constant 0 : index
    %c0_4 = arith.constant 0 : index
    %3 = vector.load %arg3[%c0_3, %c0_4] : memref<1x128xf32, #tpu.memory_space<vmem>>, vector<1x128xf32>
    %4 = vector.broadcast %3 : vector<1x128xf32> to vector<8x128xf32>
    %5 = arith.addf %2, %4 : vector<8x128xf32>
    %c0_5 = arith.constant 0 : index
    %c0_6 = arith.constant 0 : index
    %6 = vector.load %arg4[%c0_5, %c0_6] : memref<8x128xf32, #tpu.memory_space<vmem>>, vector<8x128xf32>
    tpu.vector_store %arg4[%c0_5, %c0_6], %5 {strides = array<i32>} : memref<8x128xf32, #tpu.memory_space<vmem>>, vector<8x128xf32>,
    return
  }
  func.func @transform_0(%arg0: i32) -> (i32, i32) {
    %c0_i32 = arith.constant 0 : i32
    %c0_i32_0 = arith.constant 0 : i32
    return %arg0, %c0_i32 : i32, i32
  }
  func.func @transform_1(%arg0: i32) -> (i32, i32) {
    %c0_i32 = arith.constant 0 : i32
    %c0_i32_0 = arith.constant 0 : i32
    %c0_i32_1 = arith.constant 0 : i32
    return %c0_i32, %c0_i32_0 : i32, i32
  }
  func.func @transform_2(%arg0: i32) -> (i32, i32) {
    %c0_i32 = arith.constant 0 : i32
    %c0_i32_0 = arith.constant 0 : i32
    %c0_i32_1 = arith.constant 0 : i32
    return %c0_i32, %c0_i32_0 : i32, i32
  }
  func.func @transform_3(%arg0: i32) -> (i32, i32) {
    %c0_i32 = arith.constant 0 : i32
    %c0_i32_0 = arith.constant 0 : i32
    return %arg0, %c0_i32 : i32, i32
  }
}

</mosaic_0001>

<bundles_post_ra>
// kernel: tpu_custom_call.1
= control target key start
LH: loop header
LB: loop body
LE: loop exit
PB: predicated region body
PF: predicated region fallthrough
CT: control target
= control target key end

     0   :  { %8 = vsyncpa [#allocation3], 0  ;;  %s261_s0 = inlined_call_operand.hbm [shape: f32[8,5], index: 0, kind: input, shape index: {}]   ;;  %s262_s1 = inlined_call_operand.hbm [shape: f32[5,128], index: 1, kind: input, shape index: {}]   ;;  %s263_s2 = inlined_call_operand.vmem [shape: f32[1,128], index: 2, kind: input, shape index: {}]   ;;  %s264_s3 = inlined_call_operand.hbm [shape: f32[8,128], index: 3, kind: output, shape index: {}]  }
   0x1   :  { %9 = vsyncpa [#allocation6], 0 }
   0x2   :  { %10 = vsyncpa [#allocation4], 0  ;;  %s224_s12 = smov [#allocation2]   ;;  %s225_s14 = smov [#allocation5]  }
   0x3   :  { %s17_s13 = sshll.u32 %s224_s12, 4  ;;  %s27_s15 = sshll.u32 %s225_s14, 4  ;;  %s18_s13 = int_to_ptr.vmem [resolvable:$true] %s17_s13  ;;  %s28_s15 = int_to_ptr.vmem [resolvable:$true] %s27_s15 }
   0x4   :  { %s166_s16 = scalar_lea.vmem %s18_s13, 128  ;;  %p171_p1 = scmp.lt.s32.totalorder %s18_s13, %s18_s13 }
   0x5   :  { %p167_p0 = scmp.ne.s32.totalorder %s18_s13, %s166_s16  ;;  %p172_p2 = scmp.lt.s32.totalorder %s166_s16, %s166_s16 }
   0x7   :  { %p173_p3 = por %p172_p2, %p171_p1 }
   0x9   :  { %p174_p4 = pnand %p173_p3, %p167_p0 }
   0xb   :  { %177 = shalt.err (!%p174_p4)
}
   0xc   :  { %20 = dma.hbm_to_vmem [thread:$0]  %s261_s0, 128, %s18_s13, [#allocation3]  }
   0xd   :  { %s186_s19 = scalar_lea.vmem %s28_s15, 128  ;;  %p191_p6 = scmp.lt.s32.totalorder %s28_s15, %s28_s15 }
   0xe   :  { %p187_p5 = scmp.ne.s32.totalorder %s28_s15, %s186_s19  ;;  %p192_p7 = scmp.lt.s32.totalorder %s186_s19, %s186_s19 }
  0x10   :  { %p193_p8 = por %p192_p7, %p191_p6 }
  0x12   :  { %p194_p9 = pnand %p193_p8, %p187_p5 }
  0x14   :  { %197 = shalt.err (!%p194_p9)
}
  0x15   :  { %30 = dma.hbm_to_vmem [thread:$0]  %s262_s1, 128, %s28_s15, [#allocation6]  }
  0x16   :  { %218 = dma.done.wait [#allocation3], 128  }
  0x17   :  { %219 = vsyncadd [#allocation3], 4294967168 }
  0x18   :  { %220 = dma.done.wait [#allocation6], 128  }
  0x19   :  { %221 = vsyncadd [#allocation6], 4294967168  ;;  %v226_v0 = vmov 0.0   ;;  %vm227_vm0 = vmmov 0   ;;  %vm52_vm1 = vcmask 1044480   ;;  %vm48_vm2 = vcmask 39936  }
  0x1a   :  { %148 = vmatprep.subr.mxu0 %v226_v0  ;;  %150 = vmatprep.mubr.msk.f32.mxu0 %vm227_vm0, %v226_v0  ;;  %v40_v1 = vld [vmem:[#allocation5] sm:$0x1f]  ;;  %v39_v2 = vld [vmem:[#allocation2] sm:$0xff]  ;;  %s228_s23 = smov [#allocation7]  }
  0x1b   :  { %149 = vmatpush3.msk.msra.mxu0 %vm52_vm1, %v40_v1  ;;  %v143_v3 = vld [vmem:[%s263_s2] ss:$0 sm:$0xff]  ;;  %s133_s1 = sshll.u32 %s228_s23, 4  ;;  %s134_s1 = int_to_ptr.vmem [resolvable:$true] %s133_s1 }
  0x1c   :  { %151 = vmatmul.mubr.msk.f32.vlgmr.msra.gmra.mxu0 %vm48_vm2, %v39_v2  ;;  %s198_s24 = scalar_lea.vmem %s134_s1, 128  ;;  %p203_p11 = scmp.lt.s32.totalorder %s134_s1, %s134_s1 }
  0x1d   :  { %p199_p10 = scmp.ne.s32.totalorder %s134_s1, %s198_s24  ;;  %p204_p12 = scmp.lt.s32.totalorder %s198_s24, %s198_s24 }
  0x1f   :  { %p205_p13 = por %p204_p12, %p203_p11 }
  0x21   :  { %p206_p0 = pnand %p205_p13, %p199_p10 }
  0xdc   :  { %v122_v4 = vpop.f32.mrf.mxu0 }
  0xdd   :  { %v123_v5 = vadd.f32 %v143_v3, %v122_v4 }
  0xde   :  { %v152_v6 = vpop.f32.mrf.mxu0 }
  0xdf   :  { %126 = vst [vmem:[#allocation7] sm:$0xff] %v123_v5 }
  0xe0   :  { %209 = shalt.err (!%p206_p0)
}
  0xe1   :  { %136 = dma.vmem_to_hbm [thread:$0]  %s134_s1, 128, %s264_s3, [#allocation4]  }
  0xe2   :  { %222 = dma.done.wait [#allocation4], 128  }
  0xe3   :  { %223 = vsyncadd [#allocation4], 4294967168 }
  0xe4   :  { %140 = vsyncpa [#allocation3], 1 }
  0xe5   :  { %141 = vsyncpa [#allocation6], 1 }
  0xe6   :  { %142 = vsyncpa [#allocation4], 1 }

</bundles_post_ra>
